<compile_context>
chip_gen: v7x
topology: tpu7x:2x2x1
jax: 0.10.0
libtpu: 0.0.40
codegen_flags: <defaults>
</compile_context>

<pallas_src>
import functools

import jax
import jax.numpy as jnp
from jax.experimental import pallas as pl
from jax.experimental.pallas import tpu as pltpu

# ----------------------------- config (mirrors the PyTorch module) -----------------------------
LSTM_para = {"hidden_dim": 16, "layer": 1, "bidirectional": False}

INPUT_LEN = 8      # seq_len
PRED_LEN = 4
DATA_DIFF = 1      # -> var_len = 1 + DATA_DIFF
VAR_LEN = 1 + DATA_DIFF
OUT_DIM = 1
HIDDEN = LSTM_para["hidden_dim"]
HIDDEN_HALF = HIDDEN // 2
BATCH = 2


# ----------------------------------------- Pallas kernel ----------------------------------------
def _lstm_model_kernel(x_ref, p_ref, y_ref):
    """
    x_ref: [seq, bs, in_dim] f32 VMEM   (time-major diff features)
    p_ref: [H + in_dim + 2, 4H] f32 VMEM, packed parameters:
        rows [0, H)              -> W_hh^T            [H, 4H]
        rows [H, H+in_dim)       -> W_ih^T            [in_dim, 4H]
        row   H+in_dim           -> b_ih + b_hh       [4H]
        row   H+in_dim+1         -> lanes [0, H) = w_eff (fc_w.T @ out_w.T), lane H = b_eff
    y_ref: [bs, pred_len] f32 VMEM      (output, batch-major)
    """
    seq, bs, in_dim = x_ref.shape
    H = p_ref.shape[1] // 4
    pred_len = y_ref.shape[1]
    start = seq - pred_len

    # Static slices into the packed parameter slab (zero-cost views).
    w_hh_t = p_ref[0:H, :]                                    # [H, 4H]
    w_ih_t = p_ref[H:H + in_dim, :]                           # [in_dim, 4H]
    b = p_ref[H + in_dim:H + in_dim + 1, :]                   # [1, 4H]
    w_eff = p_ref[H + in_dim + 1:H + in_dim + 2, 0:H]         # [1, H]
    b_eff = p_ref[H + in_dim + 1:H + in_dim + 2, H:H + 1]     # [1, 1]

    # Input projection hoisted out of the recurrence: one matmul for all timesteps.
    x = x_ref[...]                                            # [seq, bs, in_dim]
    x_proj = jnp.einsum("sbi,ig->sbg", x, w_ih_t,
                        preferred_element_type=jnp.float32) + b   # [seq, bs, 4H]

    h = jnp.zeros((bs, H), jnp.float32)
    c = jnp.zeros((bs, H), jnp.float32)

    # Fully unrolled recurrence (seq is small and static).
    for t in range(seq):
        gates = x_proj[t] + jnp.dot(h, w_hh_t,
                                    preferred_element_type=jnp.float32)  # [bs, 4H]
        i = jax.nn.sigmoid(gates[:, 0:H])
        f = jax.nn.sigmoid(gates[:, H:2 * H])
        g = jnp.tanh(gates[:, 2 * H:3 * H])
        o = jax.nn.sigmoid(gates[:, 3 * H:4 * H])
        c = f * c + i * g
        h = o * jnp.tanh(c)
        if t >= start:
            # Fused fc -> out_fc applied only to the needed steps; write output directly.
            j = t - start
            y_t = jnp.sum(h * w_eff, axis=-1, keepdims=True) + b_eff    # [bs, 1]
            y_ref[:, j:j + 1] = y_t


# ------------------------------------------- wrappers -------------------------------------------
def _diff_features(x, diff):
    """x: [bs, seq] -> [bs, seq, 1 + diff] (mirrors the PyTorch preprocessing)."""
    x = x[:, :, None]
    bz = x.shape[0]
    if diff != 0:
        diff_data = []
        inputs_diff = x
        for _ in range(diff):
            inputs_diff = inputs_diff[:, 1:, :] - inputs_diff[:, :-1, :]
            inputs_diff = jnp.concatenate(
                [jnp.zeros((bz, 1, 1), x.dtype), inputs_diff], axis=1)
            diff_data.append(inputs_diff)
        inputs_diff = jnp.concatenate(diff_data, axis=2)
        x = jnp.concatenate([x, inputs_diff], axis=2)
    return x


def lstm_model_pallas(x, packed_params, *, pred_len, diff):
    """x: [bs, seq] f32. packed_params: [H + in_dim + 2, 4H] f32. Returns [bs, pred_len] f32."""
    x_feat = _diff_features(x, diff)                 # [bs, seq, in_dim]
    x_tm = jnp.transpose(x_feat, (1, 0, 2))          # [seq, bs, in_dim]  (time-major)
    bs = x.shape[0]

    vmem = pl.BlockSpec(memory_space=pltpu.MemorySpace.VMEM)
    return pl.pallas_call(
        _lstm_model_kernel,
        out_shape=jax.ShapeDtypeStruct((bs, pred_len), jnp.float32),
        in_specs=[vmem, vmem],
        out_specs=vmem,
    )(x_tm, packed_params)


# -------------------------------------- parameter construction ----------------------------------
def init_params(key):
    """Deterministic raw params in PyTorch layout with default-style uniform init."""
    k_lstm = 1.0 / jnp.sqrt(HIDDEN)
    k_fc = 1.0 / jnp.sqrt(HIDDEN)
    k_out = 1.0 / jnp.sqrt(HIDDEN_HALF)
    ks = jax.random.split(key, 8)
    u = lambda k, shape, bound: jax.random.uniform(
        k, shape, jnp.float32, minval=-bound, maxval=bound)
    return dict(
        w_ih=u(ks[0], (4 * HIDDEN, VAR_LEN), k_lstm),       # PyTorch weight_ih_l0
        w_hh=u(ks[1], (4 * HIDDEN, HIDDEN), k_lstm),        # PyTorch weight_hh_l0
        b_ih=u(ks[2], (4 * HIDDEN,), k_lstm),
        b_hh=u(ks[3], (4 * HIDDEN,), k_lstm),
        fc_w=u(ks[4], (HIDDEN_HALF, HIDDEN), k_fc),         # fc.weight
        fc_b=u(ks[5], (HIDDEN_HALF,), k_fc),
        out_w=u(ks[6], (OUT_DIM, HIDDEN_HALF), k_out),      # out_fc.weight
        out_b=u(ks[7], (OUT_DIM,), k_out),
    )


def pack_params(p):
    """One VMEM slab: [W_hh^T ; W_ih^T ; (b_ih+b_hh) ; [w_eff | b_eff | 0...]]  -> [H+in_dim+2, 4H]."""
    H = HIDDEN
    four_h = 4 * H
    w_hh_t = p["w_hh"].T                                     # [H, 4H]
    w_ih_t = p["w_ih"].T                                     # [in_dim, 4H]
    b = (p["b_ih"] + p["b_hh"])[None, :]                     # [1, 4H]
    # Exact fusion of fc -> out_fc (no nonlinearity in between).
    w_eff = p["fc_w"].T @ p["out_w"].T                       # [H, 1]
    b_eff = p["fc_b"] @ p["out_w"].T + p["out_b"]            # [1]
    out_row = jnp.zeros((1, four_h), jnp.float32)
    out_row = out_row.at[0, :H].set(w_eff[:, 0])
    out_row = out_row.at[0, H].set(b_eff[0])
    return jnp.concatenate([w_hh_t, w_ih_t, b, out_row], axis=0).astype(jnp.float32)


# ----------------------------------- pure-JAX reference (checking) ------------------------------
def ref_forward(x, p, *, pred_len, diff):
    x = _diff_features(x, diff)
    bs, seq, _ = x.shape
    H = HIDDEN
    w_ih_t = p["w_ih"].T
    w_hh_t = p["w_hh"].T
    b = p["b_ih"] + p["b_hh"]
    h = jnp.zeros((bs, H), jnp.float32)
    c = jnp.zeros((bs, H), jnp.float32)
    feats = []
    for t in range(seq):
        gates = x[:, t, :] @ w_ih_t + h @ w_hh_t + b
        i = jax.nn.sigmoid(gates[:, :H])
        f = jax.nn.sigmoid(gates[:, H:2 * H])
        g = jnp.tanh(gates[:, 2 * H:3 * H])
        o = jax.nn.sigmoid(gates[:, 3 * H:])
        c = f * c + i * g
        h = o * jnp.tanh(c)
        feats.append(h)
    feat = jnp.stack(feats, axis=1)                          # [bs, seq, H]
    hmid = feat @ p["fc_w"].T + p["fc_b"]
    out = hmid @ p["out_w"].T + p["out_b"]                   # [bs, seq, out_dim]
    return out[:, -pred_len:, 0]


# ------------------------------------------------ main ------------------------------------------
if __name__ == "__main__":
    key = jax.random.PRNGKey(0)
    k_x, k_p = jax.random.split(key)

    x = jax.random.normal(k_x, (BATCH, INPUT_LEN), jnp.float32)   # [bs, seq]
    raw_params = init_params(k_p)
    packed = pack_params(raw_params)                              # packed once, outside the call

    fwd = jax.jit(functools.partial(lstm_model_pallas, pred_len=PRED_LEN, diff=DATA_DIFF))
    y = jax.block_until_ready(fwd(x, packed))

    y_ref = ref_forward(x, raw_params, pred_len=PRED_LEN, diff=DATA_DIFF)
    assert y.shape == (BATCH, PRED_LEN), y.shape
    assert jnp.allclose(y, y_ref, atol=1e-5, rtol=1e-5), (y, y_ref)

    print("KERNEL_OK")
</pallas_src>

<mosaic_0001>
module attributes {stable_mosaic.version = 11 : i64} {
  func.func @_lstm_model_kernel(%arg0: memref<8x2x2xf32, #tpu.memory_space<vmem>>, %arg1: memref<20x64xf32, #tpu.memory_space<vmem>>, %arg2: memref<2x4xf32, #tpu.memory_space<vmem>>) attributes {dimension_semantics = [], scalar_prefetch = 0 : i64, scratch_operands = 0 : i64, tpu.core_type = #tpu.core_type<tc>} {
    %c0 = arith.constant 0 : index
    %c0_0 = arith.constant 0 : index
    %0 = vector.load %arg1[%c0, %c0_0] : memref<20x64xf32, #tpu.memory_space<vmem>>, vector<16x64xf32>
    %c16 = arith.constant 16 : index
    %c0_1 = arith.constant 0 : index
    %1 = vector.load %arg1[%c16, %c0_1] : memref<20x64xf32, #tpu.memory_space<vmem>>, vector<2x64xf32>
    %c18 = arith.constant 18 : index
    %c0_2 = arith.constant 0 : index
    %2 = vector.load %arg1[%c18, %c0_2] : memref<20x64xf32, #tpu.memory_space<vmem>>, vector<1x64xf32>
    %c19 = arith.constant 19 : index
    %c0_3 = arith.constant 0 : index
    %3 = vector.load %arg1[%c19, %c0_3] : memref<20x64xf32, #tpu.memory_space<vmem>>, vector<1x16xf32>
    %c19_4 = arith.constant 19 : index
    %c16_5 = arith.constant 16 : index
    %4 = vector.load %arg1[%c19_4, %c16_5] : memref<20x64xf32, #tpu.memory_space<vmem>>, vector<1x1xf32>
    %c0_6 = arith.constant 0 : index
    %c0_7 = arith.constant 0 : index
    %c0_8 = arith.constant 0 : index
    %5 = vector.load %arg0[%c0_6, %c0_7, %c0_8] : memref<8x2x2xf32, #tpu.memory_space<vmem>>, vector<8x2x2xf32>
    "tpu.trace_start"() <{level = 10 : i32, message = "sbi,ig->sbg"}> : () -> ()
    %cst = arith.constant dense<0.000000e+00> : vector<8x2x64xf32>
    %6 = tpu.matmul %5, %1, %cst {dimension_numbers = #tpu.dot_dimension_numbers<[2], [0], [0, 1], [1], [0, 0, 0, 1, 1, 1], [], []>} : vector<8x2x2xf32>, vector<2x64xf32>, vector<8x2x64xf32> -> vector<8x2x64xf32>
    "tpu.trace_stop"() : () -> ()
    %7 = vector.shape_cast %2 : vector<1x64xf32> to vector<1x1x64xf32>
    %8 = vector.broadcast %7 : vector<1x1x64xf32> to vector<8x2x64xf32>
    %9 = arith.addf %6, %8 : vector<8x2x64xf32>
    %cst_9 = arith.constant 0.000000e+00 : f32
    %10 = vector.broadcast %cst_9 : f32 to vector<2x16xf32>
    %cst_10 = arith.constant 0.000000e+00 : f32
    %11 = vector.broadcast %cst_10 : f32 to vector<2x16xf32>
    %12 = vector.extract_strided_slice %9 {offsets = [0, 0, 0], sizes = [1, 2, 64], strides = [1, 1, 1]} : vector<8x2x64xf32> to vector<1x2x64xf32>
    %13 = vector.shape_cast %12 : vector<1x2x64xf32> to vector<2x64xf32>
    %cst_11 = arith.constant dense<0.000000e+00> : vector<2x64xf32>
    %14 = tpu.matmul %10, %0, %cst_11 {dimension_numbers = #tpu.dot_dimension_numbers<[1], [0], [0], [1], [0, 0, 1, 1], [], []>} : vector<2x16xf32>, vector<16x64xf32>, vector<2x64xf32> -> vector<2x64xf32>
    %15 = arith.addf %13, %14 : vector<2x64xf32>
    %16 = vector.extract_strided_slice %15 {offsets = [0, 0], sizes = [2, 16], strides = [1, 1]} : vector<2x64xf32> to vector<2x16xf32>
    %17 = arith.negf %16 : vector<2x16xf32>
    %18 = math.exp %17 : vector<2x16xf32>
    %cst_12 = arith.constant 1.000000e+00 : f32
    %19 = vector.broadcast %cst_12 : f32 to vector<2x16xf32>
    %20 = arith.addf %19, %18 : vector<2x16xf32>
    %21 = arith.divf %19, %20 : vector<2x16xf32>
    %22 = vector.extract_strided_slice %15 {offsets = [0, 16], sizes = [2, 16], strides = [1, 1]} : vector<2x64xf32> to vector<2x16xf32>
    %23 = arith.negf %22 : vector<2x16xf32>
    %24 = math.exp %23 : vector<2x16xf32>
    %cst_13 = arith.constant 1.000000e+00 : f32
    %25 = vector.broadcast %cst_13 : f32 to vector<2x16xf32>
    %26 = arith.addf %25, %24 : vector<2x16xf32>
    %27 = arith.divf %25, %26 : vector<2x16xf32>
    %28 = vector.extract_strided_slice %15 {offsets = [0, 32], sizes = [2, 16], strides = [1, 1]} : vector<2x64xf32> to vector<2x16xf32>
    %29 = math.tanh %28 : vector<2x16xf32>
    %30 = vector.extract_strided_slice %15 {offsets = [0, 48], sizes = [2, 16], strides = [1, 1]} : vector<2x64xf32> to vector<2x16xf32>
    %31 = arith.negf %30 : vector<2x16xf32>
    %32 = math.exp %31 : vector<2x16xf32>
    %cst_14 = arith.constant 1.000000e+00 : f32
    %33 = vector.broadcast %cst_14 : f32 to vector<2x16xf32>
    %34 = arith.addf %33, %32 : vector<2x16xf32>
    %35 = arith.divf %33, %34 : vector<2x16xf32>
    %36 = arith.mulf %27, %11 : vector<2x16xf32>
    %37 = arith.mulf %21, %29 : vector<2x16xf32>
    %38 = arith.addf %36, %37 : vector<2x16xf32>
    %39 = math.tanh %38 : vector<2x16xf32>
    %40 = arith.mulf %35, %39 : vector<2x16xf32>
    %41 = vector.extract_strided_slice %9 {offsets = [1, 0, 0], sizes = [1, 2, 64], strides = [1, 1, 1]} : vector<8x2x64xf32> to vector<1x2x64xf32>
    %42 = vector.shape_cast %41 : vector<1x2x64xf32> to vector<2x64xf32>
    %cst_15 = arith.constant dense<0.000000e+00> : vector<2x64xf32>
    %43 = tpu.matmul %40, %0, %cst_15 {dimension_numbers = #tpu.dot_dimension_numbers<[1], [0], [0], [1], [0, 0, 1, 1], [], []>} : vector<2x16xf32>, vector<16x64xf32>, vector<2x64xf32> -> vector<2x64xf32>
    %44 = arith.addf %42, %43 : vector<2x64xf32>
    %45 = vector.extract_strided_slice %44 {offsets = [0, 0], sizes = [2, 16], strides = [1, 1]} : vector<2x64xf32> to vector<2x16xf32>
    %46 = arith.negf %45 : vector<2x16xf32>
    %47 = math.exp %46 : vector<2x16xf32>
    %cst_16 = arith.constant 1.000000e+00 : f32
    %48 = vector.broadcast %cst_16 : f32 to vector<2x16xf32>
    %49 = arith.addf %48, %47 : vector<2x16xf32>
    %50 = arith.divf %48, %49 : vector<2x16xf32>
    %51 = vector.extract_strided_slice %44 {offsets = [0, 16], sizes = [2, 16], strides = [1, 1]} : vector<2x64xf32> to vector<2x16xf32>
    %52 = arith.negf %51 : vector<2x16xf32>
    %53 = math.exp %52 : vector<2x16xf32>
    %cst_17 = arith.constant 1.000000e+00 : f32
    %54 = vector.broadcast %cst_17 : f32 to vector<2x16xf32>
    %55 = arith.addf %54, %53 : vector<2x16xf32>
    %56 = arith.divf %54, %55 : vector<2x16xf32>
    %57 = vector.extract_strided_slice %44 {offsets = [0, 32], sizes = [2, 16], strides = [1, 1]} : vector<2x64xf32> to vector<2x16xf32>
    %58 = math.tanh %57 : vector<2x16xf32>
    %59 = vector.extract_strided_slice %44 {offsets = [0, 48], sizes = [2, 16], strides = [1, 1]} : vector<2x64xf32> to vector<2x16xf32>
    %60 = arith.negf %59 : vector<2x16xf32>
    %61 = math.exp %60 : vector<2x16xf32>
    %cst_18 = arith.constant 1.000000e+00 : f32
    %62 = vector.broadcast %cst_18 : f32 to vector<2x16xf32>
    %63 = arith.addf %62, %61 : vector<2x16xf32>
    %64 = arith.divf %62, %63 : vector<2x16xf32>
    %65 = arith.mulf %56, %38 : vector<2x16xf32>
    %66 = arith.mulf %50, %58 : vector<2x16xf32>
    %67 = arith.addf %65, %66 : vector<2x16xf32>
    %68 = math.tanh %67 : vector<2x16xf32>
    %69 = arith.mulf %64, %68 : vector<2x16xf32>
    %70 = vector.extract_strided_slice %9 {offsets = [2, 0, 0], sizes = [1, 2, 64], strides = [1, 1, 1]} : vector<8x2x64xf32> to vector<1x2x64xf32>
    %71 = vector.shape_cast %70 : vector<1x2x64xf32> to vector<2x64xf32>
    %cst_19 = arith.constant dense<0.000000e+00> : vector<2x64xf32>
    %72 = tpu.matmul %69, %0, %cst_19 {dimension_numbers = #tpu.dot_dimension_numbers<[1], [0], [0], [1], [0, 0, 1, 1], [], []>} : vector<2x16xf32>, vector<16x64xf32>, vector<2x64xf32> -> vector<2x64xf32>
    %73 = arith.addf %71, %72 : vector<2x64xf32>
    %74 = vector.extract_strided_slice %73 {offsets = [0, 0], sizes = [2, 16], strides = [1, 1]} : vector<2x64xf32> to vector<2x16xf32>
    %75 = arith.negf %74 : vector<2x16xf32>
    %76 = math.exp %75 : vector<2x16xf32>
    %cst_20 = arith.constant 1.000000e+00 : f32
    %77 = vector.broadcast %cst_20 : f32 to vector<2x16xf32>
    %78 = arith.addf %77, %76 : vector<2x16xf32>
    %79 = arith.divf %77, %78 : vector<2x16xf32>
    %80 = vector.extract_strided_slice %73 {offsets = [0, 16], sizes = [2, 16], strides = [1, 1]} : vector<2x64xf32> to vector<2x16xf32>
    %81 = arith.negf %80 : vector<2x16xf32>
    %82 = math.exp %81 : vector<2x16xf32>
    %cst_21 = arith.constant 1.000000e+00 : f32
    %83 = vector.broadcast %cst_21 : f32 to vector<2x16xf32>
    %84 = arith.addf %83, %82 : vector<2x16xf32>
    %85 = arith.divf %83, %84 : vector<2x16xf32>
    %86 = vector.extract_strided_slice %73 {offsets = [0, 32], sizes = [2, 16], strides = [1, 1]} : vector<2x64xf32> to vector<2x16xf32>
    %87 = math.tanh %86 : vector<2x16xf32>
    %88 = vector.extract_strided_slice %73 {offsets = [0, 48], sizes = [2, 16], strides = [1, 1]} : vector<2x64xf32> to vector<2x16xf32>
    %89 = arith.negf %88 : vector<2x16xf32>
    %90 = math.exp %89 : vector<2x16xf32>
    %cst_22 = arith.constant 1.000000e+00 : f32
    %91 = vector.broadcast %cst_22 : f32 to vector<2x16xf32>
    %92 = arith.addf %91, %90 : vector<2x16xf32>
    %93 = arith.divf %91, %92 : vector<2x16xf32>
    %94 = arith.mulf %85, %67 : vector<2x16xf32>
    %95 = arith.mulf %79, %87 : vector<2x16xf32>
    %96 = arith.addf %94, %95 : vector<2x16xf32>
    %97 = math.tanh %96 : vector<2x16xf32>
    %98 = arith.mulf %93, %97 : vector<2x16xf32>
    %99 = vector.extract_strided_slice %9 {offsets = [3, 0, 0], sizes = [1, 2, 64], strides = [1, 1, 1]} : vector<8x2x64xf32> to vector<1x2x64xf32>
    %100 = vector.shape_cast %99 : vector<1x2x64xf32> to vector<2x64xf32>
    %cst_23 = arith.constant dense<0.000000e+00> : vector<2x64xf32>
    %101 = tpu.matmul %98, %0, %cst_23 {dimension_numbers = #tpu.dot_dimension_numbers<[1], [0], [0], [1], [0, 0, 1, 1], [], []>} : vector<2x16xf32>, vector<16x64xf32>, vector<2x64xf32> -> vector<2x64xf32>
    %102 = arith.addf %100, %101 : vector<2x64xf32>
    %103 = vector.extract_strided_slice %102 {offsets = [0, 0], sizes = [2, 16], strides = [1, 1]} : vector<2x64xf32> to vector<2x16xf32>
    %104 = arith.negf %103 : vector<2x16xf32>
    %105 = math.exp %104 : vector<2x16xf32>
    %cst_24 = arith.constant 1.000000e+00 : f32
    %106 = vector.broadcast %cst_24 : f32 to vector<2x16xf32>
    %107 = arith.addf %106, %105 : vector<2x16xf32>
    %108 = arith.divf %106, %107 : vector<2x16xf32>
    %109 = vector.extract_strided_slice %102 {offsets = [0, 16], sizes = [2, 16], strides = [1, 1]} : vector<2x64xf32> to vector<2x16xf32>
    %110 = arith.negf %109 : vector<2x16xf32>
    %111 = math.exp %110 : vector<2x16xf32>
    %cst_25 = arith.constant 1.000000e+00 : f32
    %112 = vector.broadcast %cst_25 : f32 to vector<2x16xf32>
    %113 = arith.addf %112, %111 : vector<2x16xf32>
    %114 = arith.divf %112, %113 : vector<2x16xf32>
    %115 = vector.extract_strided_slice %102 {offsets = [0, 32], sizes = [2, 16], strides = [1, 1]} : vector<2x64xf32> to vector<2x16xf32>
    %116 = math.tanh %115 : vector<2x16xf32>
    %117 = vector.extract_strided_slice %102 {offsets = [0, 48], sizes = [2, 16], strides = [1, 1]} : vector<2x64xf32> to vector<2x16xf32>
    %118 = arith.negf %117 : vector<2x16xf32>
    %119 = math.exp %118 : vector<2x16xf32>
    %cst_26 = arith.constant 1.000000e+00 : f32
    %120 = vector.broadcast %cst_26 : f32 to vector<2x16xf32>
    %121 = arith.addf %120, %119 : vector<2x16xf32>
    %122 = arith.divf %120, %121 : vector<2x16xf32>
    %123 = arith.mulf %114, %96 : vector<2x16xf32>
    %124 = arith.mulf %108, %116 : vector<2x16xf32>
    %125 = arith.addf %123, %124 : vector<2x16xf32>
    %126 = math.tanh %125 : vector<2x16xf32>
    %127 = arith.mulf %122, %126 : vector<2x16xf32>
    %128 = vector.extract_strided_slice %9 {offsets = [4, 0, 0], sizes = [1, 2, 64], strides = [1, 1, 1]} : vector<8x2x64xf32> to vector<1x2x64xf32>
    %129 = vector.shape_cast %128 : vector<1x2x64xf32> to vector<2x64xf32>
    %cst_27 = arith.constant dense<0.000000e+00> : vector<2x64xf32>
    %130 = tpu.matmul %127, %0, %cst_27 {dimension_numbers = #tpu.dot_dimension_numbers<[1], [0], [0], [1], [0, 0, 1, 1], [], []>} : vector<2x16xf32>, vector<16x64xf32>, vector<2x64xf32> -> vector<2x64xf32>
    %131 = arith.addf %129, %130 : vector<2x64xf32>
    %132 = vector.extract_strided_slice %131 {offsets = [0, 0], sizes = [2, 16], strides = [1, 1]} : vector<2x64xf32> to vector<2x16xf32>
    %133 = arith.negf %132 : vector<2x16xf32>
    %134 = math.exp %133 : vector<2x16xf32>
    %cst_28 = arith.constant 1.000000e+00 : f32
    %135 = vector.broadcast %cst_28 : f32 to vector<2x16xf32>
    %136 = arith.addf %135, %134 : vector<2x16xf32>
    %137 = arith.divf %135, %136 : vector<2x16xf32>
    %138 = vector.extract_strided_slice %131 {offsets = [0, 16], sizes = [2, 16], strides = [1, 1]} : vector<2x64xf32> to vector<2x16xf32>
    %139 = arith.negf %138 : vector<2x16xf32>
    %140 = math.exp %139 : vector<2x16xf32>
    %cst_29 = arith.constant 1.000000e+00 : f32
    %141 = vector.broadcast %cst_29 : f32 to vector<2x16xf32>
    %142 = arith.addf %141, %140 : vector<2x16xf32>
    %143 = arith.divf %141, %142 : vector<2x16xf32>
    %144 = vector.extract_strided_slice %131 {offsets = [0, 32], sizes = [2, 16], strides = [1, 1]} : vector<2x64xf32> to vector<2x16xf32>
    %145 = math.tanh %144 : vector<2x16xf32>
    %146 = vector.extract_strided_slice %131 {offsets = [0, 48], sizes = [2, 16], strides = [1, 1]} : vector<2x64xf32> to vector<2x16xf32>
    %147 = arith.negf %146 : vector<2x16xf32>
    %148 = math.exp %147 : vector<2x16xf32>
    %cst_30 = arith.constant 1.000000e+00 : f32
    %149 = vector.broadcast %cst_30 : f32 to vector<2x16xf32>
    %150 = arith.addf %149, %148 : vector<2x16xf32>
    %151 = arith.divf %149, %150 : vector<2x16xf32>
    %152 = arith.mulf %143, %125 : vector<2x16xf32>
    %153 = arith.mulf %137, %145 : vector<2x16xf32>
    %154 = arith.addf %152, %153 : vector<2x16xf32>
    %155 = math.tanh %154 : vector<2x16xf32>
    %156 = arith.mulf %151, %155 : vector<2x16xf32>
    %157 = vector.broadcast %3 : vector<1x16xf32> to vector<2x16xf32>
    %158 = arith.mulf %156, %157 : vector<2x16xf32>
    %cst_31 = arith.constant dense<0.000000e+00> : vector<2xf32>
    %159 = vector.multi_reduction <add>, %158, %cst_31 [1] : vector<2x16xf32> to vector<2xf32>
    %160 = vector.shape_cast %159 : vector<2xf32> to vector<2x1xf32>
    %161 = vector.broadcast %4 : vector<1x1xf32> to vector<2x1xf32>
    %162 = arith.addf %160, %161 : vector<2x1xf32>
    %c0_32 = arith.constant 0 : index
    %c0_33 = arith.constant 0 : index
    %163 = vector.load %arg2[%c0_32, %c0_33] : memref<2x4xf32, #tpu.memory_space<vmem>>, vector<2x1xf32>
    tpu.vector_store %arg2[%c0_32, %c0_33], %162 {strides = array<i32>} : memref<2x4xf32, #tpu.memory_space<vmem>>, vector<2x1xf32>,
    %164 = vector.extract_strided_slice %9 {offsets = [5, 0, 0], sizes = [1, 2, 64], strides = [1, 1, 1]} : vector<8x2x64xf32> to vector<1x2x64xf32>
    %165 = vector.shape_cast %164 : vector<1x2x64xf32> to vector<2x64xf32>
    %cst_34 = arith.constant dense<0.000000e+00> : vector<2x64xf32>
    %166 = tpu.matmul %156, %0, %cst_34 {dimension_numbers = #tpu.dot_dimension_numbers<[1], [0], [0], [1], [0, 0, 1, 1], [], []>} : vector<2x16xf32>, vector<16x64xf32>, vector<2x64xf32> -> vector<2x64xf32>
    %167 = arith.addf %165, %166 : vector<2x64xf32>
    %168 = vector.extract_strided_slice %167 {offsets = [0, 0], sizes = [2, 16], strides = [1, 1]} : vector<2x64xf32> to vector<2x16xf32>
    %169 = arith.negf %168 : vector<2x16xf32>
    %170 = math.exp %169 : vector<2x16xf32>
    %cst_35 = arith.constant 1.000000e+00 : f32
    %171 = vector.broadcast %cst_35 : f32 to vector<2x16xf32>
    %172 = arith.addf %171, %170 : vector<2x16xf32>
    %173 = arith.divf %171, %172 : vector<2x16xf32>
    %174 = vector.extract_strided_slice %167 {offsets = [0, 16], sizes = [2, 16], strides = [1, 1]} : vector<2x64xf32> to vector<2x16xf32>
    %175 = arith.negf %174 : vector<2x16xf32>
    %176 = math.exp %175 : vector<2x16xf32>
    %cst_36 = arith.constant 1.000000e+00 : f32
    %177 = vector.broadcast %cst_36 : f32 to vector<2x16xf32>
    %178 = arith.addf %177, %176 : vector<2x16xf32>
    %179 = arith.divf %177, %178 : vector<2x16xf32>
    %180 = vector.extract_strided_slice %167 {offsets = [0, 32], sizes = [2, 16], strides = [1, 1]} : vector<2x64xf32> to vector<2x16xf32>
    %181 = math.tanh %180 : vector<2x16xf32>
    %182 = vector.extract_strided_slice %167 {offsets = [0, 48], sizes = [2, 16], strides = [1, 1]} : vector<2x64xf32> to vector<2x16xf32>
    %183 = arith.negf %182 : vector<2x16xf32>
    %184 = math.exp %183 : vector<2x16xf32>
    %cst_37 = arith.constant 1.000000e+00 : f32
    %185 = vector.broadcast %cst_37 : f32 to vector<2x16xf32>
    %186 = arith.addf %185, %184 : vector<2x16xf32>
    %187 = arith.divf %185, %186 : vector<2x16xf32>
    %188 = arith.mulf %179, %154 : vector<2x16xf32>
    %189 = arith.mulf %173, %181 : vector<2x16xf32>
    %190 = arith.addf %188, %189 : vector<2x16xf32>
    %191 = math.tanh %190 : vector<2x16xf32>
    %192 = arith.mulf %187, %191 : vector<2x16xf32>
    %193 = vector.broadcast %3 : vector<1x16xf32> to vector<2x16xf32>
    %194 = arith.mulf %192, %193 : vector<2x16xf32>
    %cst_38 = arith.constant dense<0.000000e+00> : vector<2xf32>
    %195 = vector.multi_reduction <add>, %194, %cst_38 [1] : vector<2x16xf32> to vector<2xf32>
    %196 = vector.shape_cast %195 : vector<2xf32> to vector<2x1xf32>
    %197 = vector.broadcast %4 : vector<1x1xf32> to vector<2x1xf32>
    %198 = arith.addf %196, %197 : vector<2x1xf32>
    %c0_39 = arith.constant 0 : index
    %c1 = arith.constant 1 : index
    %199 = vector.load %arg2[%c0_39, %c1] : memref<2x4xf32, #tpu.memory_space<vmem>>, vector<2x1xf32>
    tpu.vector_store %arg2[%c0_39, %c1], %198 {strides = array<i32>} : memref<2x4xf32, #tpu.memory_space<vmem>>, vector<2x1xf32>,
    %200 = vector.extract_strided_slice %9 {offsets = [6, 0, 0], sizes = [1, 2, 64], strides = [1, 1, 1]} : vector<8x2x64xf32> to vector<1x2x64xf32>
    %201 = vector.shape_cast %200 : vector<1x2x64xf32> to vector<2x64xf32>
    %cst_40 = arith.constant dense<0.000000e+00> : vector<2x64xf32>
    %202 = tpu.matmul %192, %0, %cst_40 {dimension_numbers = #tpu.dot_dimension_numbers<[1], [0], [0], [1], [0, 0, 1, 1], [], []>} : vector<2x16xf32>, vector<16x64xf32>, vector<2x64xf32> -> vector<2x64xf32>
    %203 = arith.addf %201, %202 : vector<2x64xf32>
    %204 = vector.extract_strided_slice %203 {offsets = [0, 0], sizes = [2, 16], strides = [1, 1]} : vector<2x64xf32> to vector<2x16xf32>
    %205 = arith.negf %204 : vector<2x16xf32>
    %206 = math.exp %205 : vector<2x16xf32>
    %cst_41 = arith.constant 1.000000e+00 : f32
    %207 = vector.broadcast %cst_41 : f32 to vector<2x16xf32>
    %208 = arith.addf %207, %206 : vector<2x16xf32>
    %209 = arith.divf %207, %208 : vector<2x16xf32>
    %210 = vector.extract_strided_slice %203 {offsets = [0, 16], sizes = [2, 16], strides = [1, 1]} : vector<2x64xf32> to vector<2x16xf32>
    %211 = arith.negf %210 : vector<2x16xf32>
    %212 = math.exp %211 : vector<2x16xf32>
    %cst_42 = arith.constant 1.000000e+00 : f32
    %213 = vector.broadcast %cst_42 : f32 to vector<2x16xf32>
    %214 = arith.addf %213, %212 : vector<2x16xf32>
    %215 = arith.divf %213, %214 : vector<2x16xf32>
    %216 = vector.extract_strided_slice %203 {offsets = [0, 32], sizes = [2, 16], strides = [1, 1]} : vector<2x64xf32> to vector<2x16xf32>
    %217 = math.tanh %216 : vector<2x16xf32>
    %218 = vector.extract_strided_slice %203 {offsets = [0, 48], sizes = [2, 16], strides = [1, 1]} : vector<2x64xf32> to vector<2x16xf32>
    %219 = arith.negf %218 : vector<2x16xf32>
    %220 = math.exp %219 : vector<2x16xf32>
    %cst_43 = arith.constant 1.000000e+00 : f32
    %221 = vector.broadcast %cst_43 : f32 to vector<2x16xf32>
    %222 = arith.addf %221, %220 : vector<2x16xf32>
    %223 = arith.divf %221, %222 : vector<2x16xf32>
    %224 = arith.mulf %215, %190 : vector<2x16xf32>
    %225 = arith.mulf %209, %217 : vector<2x16xf32>
    %226 = arith.addf %224, %225 : vector<2x16xf32>
    %227 = math.tanh %226 : vector<2x16xf32>
    %228 = arith.mulf %223, %227 : vector<2x16xf32>
    %229 = vector.broadcast %3 : vector<1x16xf32> to vector<2x16xf32>
    %230 = arith.mulf %228, %229 : vector<2x16xf32>
    %cst_44 = arith.constant dense<0.000000e+00> : vector<2xf32>
    %231 = vector.multi_reduction <add>, %230, %cst_44 [1] : vector<2x16xf32> to vector<2xf32>
    %232 = vector.shape_cast %231 : vector<2xf32> to vector<2x1xf32>
    %233 = vector.broadcast %4 : vector<1x1xf32> to vector<2x1xf32>
    %234 = arith.addf %232, %233 : vector<2x1xf32>
    %c0_45 = arith.constant 0 : index
    %c2 = arith.constant 2 : index
    %235 = vector.load %arg2[%c0_45, %c2] : memref<2x4xf32, #tpu.memory_space<vmem>>, vector<2x1xf32>
    tpu.vector_store %arg2[%c0_45, %c2], %234 {strides = array<i32>} : memref<2x4xf32, #tpu.memory_space<vmem>>, vector<2x1xf32>,
    %236 = vector.extract_strided_slice %9 {offsets = [7, 0, 0], sizes = [1, 2, 64], strides = [1, 1, 1]} : vector<8x2x64xf32> to vector<1x2x64xf32>
    %237 = vector.shape_cast %236 : vector<1x2x64xf32> to vector<2x64xf32>
    %cst_46 = arith.constant dense<0.000000e+00> : vector<2x64xf32>
    %238 = tpu.matmul %228, %0, %cst_46 {dimension_numbers = #tpu.dot_dimension_numbers<[1], [0], [0], [1], [0, 0, 1, 1], [], []>} : vector<2x16xf32>, vector<16x64xf32>, vector<2x64xf32> -> vector<2x64xf32>
    %239 = arith.addf %237, %238 : vector<2x64xf32>
    %240 = vector.extract_strided_slice %239 {offsets = [0, 0], sizes = [2, 16], strides = [1, 1]} : vector<2x64xf32> to vector<2x16xf32>
    %241 = arith.negf %240 : vector<2x16xf32>
    %242 = math.exp %241 : vector<2x16xf32>
    %cst_47 = arith.constant 1.000000e+00 : f32
    %243 = vector.broadcast %cst_47 : f32 to vector<2x16xf32>
    %244 = arith.addf %243, %242 : vector<2x16xf32>
    %245 = arith.divf %243, %244 : vector<2x16xf32>
    %246 = vector.extract_strided_slice %239 {offsets = [0, 16], sizes = [2, 16], strides = [1, 1]} : vector<2x64xf32> to vector<2x16xf32>
    %247 = arith.negf %246 : vector<2x16xf32>
    %248 = math.exp %247 : vector<2x16xf32>
    %cst_48 = arith.constant 1.000000e+00 : f32
    %249 = vector.broadcast %cst_48 : f32 to vector<2x16xf32>
    %250 = arith.addf %249, %248 : vector<2x16xf32>
    %251 = arith.divf %249, %250 : vector<2x16xf32>
    %252 = vector.extract_strided_slice %239 {offsets = [0, 32], sizes = [2, 16], strides = [1, 1]} : vector<2x64xf32> to vector<2x16xf32>
    %253 = math.tanh %252 : vector<2x16xf32>
    %254 = vector.extract_strided_slice %239 {offsets = [0, 48], sizes = [2, 16], strides = [1, 1]} : vector<2x64xf32> to vector<2x16xf32>
    %255 = arith.negf %254 : vector<2x16xf32>
    %256 = math.exp %255 : vector<2x16xf32>
    %cst_49 = arith.constant 1.000000e+00 : f32
    %257 = vector.broadcast %cst_49 : f32 to vector<2x16xf32>
    %258 = arith.addf %257, %256 : vector<2x16xf32>
    %259 = arith.divf %257, %258 : vector<2x16xf32>
    %260 = arith.mulf %251, %226 : vector<2x16xf32>
    %261 = arith.mulf %245, %253 : vector<2x16xf32>
    %262 = arith.addf %260, %261 : vector<2x16xf32>
    %263 = math.tanh %262 : vector<2x16xf32>
    %264 = arith.mulf %259, %263 : vector<2x16xf32>
    %265 = vector.broadcast %3 : vector<1x16xf32> to vector<2x16xf32>
    %266 = arith.mulf %264, %265 : vector<2x16xf32>
    %cst_50 = arith.constant dense<0.000000e+00> : vector<2xf32>
    %267 = vector.multi_reduction <add>, %266, %cst_50 [1] : vector<2x16xf32> to vector<2xf32>
    %268 = vector.shape_cast %267 : vector<2xf32> to vector<2x1xf32>
    %269 = vector.broadcast %4 : vector<1x1xf32> to vector<2x1xf32>
    %270 = arith.addf %268, %269 : vector<2x1xf32>
    %c0_51 = arith.constant 0 : index
    %c3 = arith.constant 3 : index
    %271 = vector.load %arg2[%c0_51, %c3] : memref<2x4xf32, #tpu.memory_space<vmem>>, vector<2x1xf32>
    tpu.vector_store %arg2[%c0_51, %c3], %270 {strides = array<i32>} : memref<2x4xf32, #tpu.memory_space<vmem>>, vector<2x1xf32>,
    return
  }
}

</mosaic_0001>

<bundles_post_ra>
// kernel: lstm_model_pallas.1
= control target key start
LH: loop header
LB: loop body
LE: loop exit
PB: predicated region body
PF: predicated region fallthrough
CT: control target
= control target key end

     0   :  { %vm87_vm0 = vcmask 1041408   ;;  %v42_v2 = vlaneseq  ;;  %v1410_v10 = vmov 1983009808   ;;  %v1411_v20 = vmov 0.0|0.0   ;;  %s1619_s0 = inlined_call_operand.vmem [shape: f32[8,2,2], index: 0, kind: input, shape index: {}]   ;;  %s1620_s1 = inlined_call_operand.vmem [shape: f32[20,64], index: 1, kind: input, shape index: {}]   ;;  %s1621_s2 = inlined_call_operand.hbm [shape: f32[2,4], index: 2, kind: output, shape index: {}]  }
   0x1   :  { %v14_v0 = vld [vmem:[%s1620_s1 + $0x10] sm:$0x3]  ;;  %v17_v1 = vld [vmem:[%s1619_s0] sm:$0x3]  ;;  %v18_v3 = vld [vmem:[%s1619_s0 + $0x2] sm:$0x3]  ;;  %v40_v11 = vunpack.c.l.s4 %v1410_v10  ;;  %1284 = vmatprep.subr.bf16.mxu1 %v1411_v20 }
   0x2   :  { %1223 = vmatprep.subr.msk.mxu0 %vm87_vm0, %v14_v0  ;;  %v19_v4 = vld [vmem:[%s1619_s0 + $0x4] sm:$0x3]  ;;  %v20_v5 = vld [vmem:[%s1619_s0 + $0x6] sm:$0x3]  ;;  %v43_v6 = vshrl.u32 %v42_v2, 7  ;;  %v37_v9 = vcombine.low %v17_v1, %v18_v3  ;;  %v13_v17 = vld [vmem:[%s1620_s1 + $0x8] sm:$0xff] }
   0x3   :  { %1224 = vmatpush3.msk.msra.mxu0 %vm87_vm0, %v14_v0  ;;  %v21_v7 = vld [vmem:[%s1619_s0 + $0x8] sm:$0x3]  ;;  %v12_v8 = vld [vmem:[%s1620_s1] sm:$0xff]  ;;  %v22_v12 = vld [vmem:[%s1619_s0 + $0xa] sm:$0x3]  ;;  %v38_v15 = vcombine.low %v19_v4, %v20_v5  ;;  %v41_v18 = vunpack.c.0.s8 %v40_v11 }
   0x4   :  { %v23_v13 = vld [vmem:[%s1619_s0 + $0xc] sm:$0x3]  ;;  %v24_v14 = vld [vmem:[%s1619_s0 + $0xe] sm:$0x3]  ;;  %v54_v16 = vcombine.low %v21_v7, %v22_v12  ;;  %v1473_v21 = vpack.c.bf16 %v13_v17, %v12_v8  ;;  %1287 = vmatprep.subr.bf16.mxu0 %v1411_v20 }
   0x5   :  { %v55_v19 = vcombine.low %v23_v13, %v24_v14 }
   0x6   :  { %7 = vsyncpa [#allocation3], 0  ;;  %vm1412_vm1 = vmmov 0   ;;  %v1413_v22 = vmov 0.0   ;;  %v1478_v23 = vsub.s32 %v41_v18, %v43_v6  ;;  %1286 = vmatpush3.bf16.msra.mxu1 %v1473_v21  ;;  %vm82_vm2 = vcmask 15360   ;;  %s1414_s4 = smov 96  }
   0x7   :  { %1232 = vmatprep.mubr.msk.f32.mxu1 %vm1412_vm1, %v1413_v22  ;;  %1290 = vmatprep.subr.bf16.mxu1 %v1411_v20  ;;  %v1176_v30 = vld [vmem:[%s1620_s1 + $0x12] ss:$0 sm:$0xff]  ;;  %s1415_s5 = smov 16   ;;  %s1416_s6 = smov 32   ;;  %vm210_vm3 = vcmask 130048   ;;  %vm764_vm4 = vcmask 123904  }
   0x8   :  { %v45_v24 = vrot.slane %v37_v9, %v1478_v23  ;;  %v52_v25 = vrot.slane %v38_v15, %v1478_v23  ;;  %v62_v26 = vrot.slane %v54_v16, %v1478_v23  ;;  %v69_v27 = vrot.slane %v55_v19, %v1478_v23  ;;  %s1417_s7 = smov 80   ;;  %s1418_s10 = smov 48  }
   0x9   :  { %1233 = vmatmul.mubr.f32.vlgmr.msra.gmra.mrb[0].mxu1 %v1413_v22  ;;  %v72_v31 = vcombine.low %v1176_v30, %v1176_v30  ;;  %s1420_s11 = smov 114   ;;  %vm773_vm5 = vcmask 1024   ;;  %s1421_s12 = smov 113   ;;  %vm902_vm6 = vcmask 9224   ;;  %vm1031_vm7 = vcmask 17424  }
   0xa   :  { %v53_v28 = vcombine.low %v45_v24, %v52_v25  ;;  %v70_v29 = vcombine.low %v62_v26, %v69_v27  ;;  %1292 = vmatpush3.bf16.msra.mxu1 %v1473_v21  ;;  %1246 = vmatprep.mubr.msk.f32.mxu1 %vm1412_vm1, %v1413_v22  ;;  %s1422_s13 = smov 115   ;;  %s1423_s14 = smov [#allocation2]   ;;  %vm1160_vm8 = vcmask 25624  }
   0xb   :  { %1296 = vmatprep.subr.bf16.mxu1 %v1411_v20  ;;  %v79_v32 = vrot.slane %v72_v31, %v1478_v23  ;;  %s1168_s15 = sshll.u32 %s1423_s14, 4  ;;  %s1169_s15 = int_to_ptr.vmem [resolvable:$true] %s1168_s15 }
   0xc   :  { %1225 = vmatprep.mubr.msk.f32.mxu0 %vm82_vm2, %v53_v28  ;;  %s1386_s16 = scalar_lea.vmem %s1169_s15, 32  ;;  %p1391_p1 = scmp.lt.s32.totalorder %s1169_s15, %s1169_s15 }
   0xd   :  { %1226 = vmatmul.mubr.msk.f32.vlgmr.msra.gmra.mrb[0].mxu0 %vm82_vm2, %v70_v29  ;;  %v80_v34 = vcombine.low %v79_v32, %v79_v32  ;;  %p1387_p0 = scmp.ne.s32.totalorder %s1169_s15, %s1386_s16  ;;  %p1392_p2 = scmp.lt.s32.totalorder %s1386_s16, %s1386_s16 }
   0xe   :  { %1289 = vmatpush3.bf16.msra.mxu0 %v1473_v21  ;;  %1239 = vmatprep.mubr.msk.f32.mxu0 %vm1412_vm1, %v1413_v22 }
   0xf   :  { %1293 = vmatprep.subr.bf16.mxu0 %v1411_v20  ;;  %p1393_p3 = por %p1392_p2, %p1391_p1 }
  0x11   :  { %p1394_p4 = pnand %p1393_p3, %p1387_p0 }
  0xdc   :  { %v280_v33 = vpop.f32.mrb[0].mxu1 }
  0xdd   :  { %v1234_v35 = vpop.f32.mrb[1].mxu1 }
  0xe0   :  { %v1227_v36 = vpop.f32.mrb[0].mxu0 }
  0xe1   :  { %v1499_v37 = vadd.f32 %v1227_v36, %v80_v34  ;;  %v157_v38 = vpop.f32.mrb[1].mxu0 }
  0xe2   :  { %v1501_v39 = vadd.f32 %v157_v38, %v80_v34 }
  0xe4   :  { %v175_v40 = vrot.slane %v1501_v39, %v1478_v23  ;;  %v168_v12 = vcombine.high %v1501_v39, %v1501_v39 }
  0xe6   :  { %v284_v41 = vadd.f32 %v280_v33, %v175_v40  ;;  %v183_v57 = vcombine.high %v175_v40, %v175_v40  ;;  %v182_v13 = vrot.slane %v168_v12, %v1478_v23 }
  0xe8   :  { %1322 = vtanh.f32 %v284_v41  ;;  %v1180_v43 = vmul.f32 -1.442695, %v284_v41  ;;  %v184_v36 = vcombine.high %v182_v13, %v182_v13 }
  0xea   :  { %1324 = vpow2.f32 %v1180_v43 }
  0xf2   :  { %v1323_v42 = vpop.eup %1322 }
  0xf3   :  { %294 = vrot.lane.b32.xlu0 %v1323_v42, %s1414_s4 }
  0xf4   :  { %v1325_v44 = vpop.eup %1324 }
  0xf5   :  { %v288_v45 = vadd.f32 1.0, %v1325_v44 }
  0xf7   :  { %1326 = vrcp.f32 %v288_v45 }
 0x101   :  { %v1327_v46 = vpop.eup %1326 }
 0x102   :  { %v292_v49 = vmul.f32 0.0, %v1327_v46 }
 0x165   :  { %v295_v47 = vpop.permute.xlu0 %294 }
 0x166   :  { %v297_v48 = vmul.f32 %v1327_v46, %v295_v47 }
 0x168   :  { %299 = vrot.lane.b32.xlu0 %v297_v48, %s1415_s5 }
 0x1da   :  { %v300_v50 = vpop.permute.xlu0 %299 }
 0x1db   :  { %v302_v51 = vadd.f32 %v300_v50, %v292_v49 }
 0x1dd   :  { %1328 = vtanh.f32 %v302_v51 }
 0x1e7   :  { %v1329_v52 = vpop.eup %1328 }
 0x1e8   :  { %305 = vrot.lane.b32.xlu1 %v1329_v52, %s1416_s6 }
 0x25a   :  { %v306_v53 = vpop.permute.xlu1 %305 }
 0x25b   :  { %v308_v54 = vmul.f32 %v1327_v46, %v306_v53 }
 0x25d   :  { %v316_v55 = vrot.slane %v308_v54, %v1478_v23 }
 0x25f   :  { %317 = vrot.lane.b32.xlu1 %v316_v55, %s1417_s7  ;;  %v192_v55 = vrot.slane %v1499_v37, %v1478_v23 }
 0x2d1   :  { %v318_v56 = vpop.permute.xlu1 %317 }
 0x2d2   :  { %1240 = vmatmul.mubr.msk.f32.vlgmr.msra.gmra.mrb[2].mxu0 %vm210_vm3, %v318_v56 }
 0x2d3   :  { %1295 = vmatpush3.bf16.msra.mxu0 %v1473_v21  ;;  %1253 = vmatprep.mubr.msk.f32.mxu0 %vm1412_vm1, %v1413_v22 }
 0x2d4   :  { %1299 = vmatprep.subr.bf16.mxu0 %v1411_v20 }
 0x3a5   :  { %v387_v58 = vpop.f32.mrb[2].mxu0 }
 0x3a6   :  { %v391_v59 = vadd.f32 %v387_v58, %v183_v57  ;;  %v1241_v60 = vpop.f32.mrb[3].mxu0 }
 0x3a8   :  { %1330 = vtanh.f32 %v391_v59  ;;  %v1182_v62 = vmul.f32 -1.442695, %v391_v59 }
 0x3aa   :  { %1332 = vpow2.f32 %v1182_v62 }
 0x3b2   :  { %v1331_v61 = vpop.eup %1330 }
 0x3b3   :  { %401 = vrot.lane.b32.xlu0 %v1331_v61, %s1414_s4 }
 0x3b4   :  { %v1333_v63 = vpop.eup %1332 }
 0x3b5   :  { %v395_v0 = vadd.f32 1.0, %v1333_v63 }
 0x3b7   :  { %1334 = vrcp.f32 %v395_v0 }
 0x3c1   :  { %v1335_v1 = vpop.eup %1334 }
 0x3c2   :  { %v399_v4 = vmul.f32 %v1335_v1, %v302_v51 }
 0x425   :  { %v402_v2 = vpop.permute.xlu0 %401 }
 0x426   :  { %v404_v3 = vmul.f32 %v1335_v1, %v402_v2 }
 0x428   :  { %406 = vrot.lane.b32.xlu1 %v404_v3, %s1415_s5 }
 0x49a   :  { %v407_v5 = vpop.permute.xlu1 %406 }
 0x49b   :  { %v409_v6 = vadd.f32 %v407_v5, %v399_v4 }
 0x49d   :  { %1336 = vtanh.f32 %v409_v6 }
 0x4a7   :  { %v1337_v7 = vpop.eup %1336 }
 0x4a8   :  { %412 = vrot.lane.b32.xlu0 %v1337_v7, %s1416_s6 }
 0x51a   :  { %v413_v8 = vpop.permute.xlu0 %412 }
 0x51b   :  { %v415_v9 = vmul.f32 %v1335_v1, %v413_v8 }
 0x51d   :  { %v423_v10 = vrot.slane %v415_v9, %v1478_v23 }
 0x51f   :  { %424 = vrot.lane.b32.xlu1 %v423_v10, %s1417_s7  ;;  %v200_v10 = vcombine.high %v192_v55, %v192_v55 }
 0x591   :  { %v425_v11 = vpop.permute.xlu1 %424 }
 0x592   :  { %1247 = vmatmul.mubr.msk.f32.vlgmr.msra.gmra.mrb[2].mxu1 %vm210_vm3, %v425_v11 }
 0x593   :  { %1298 = vmatpush3.bf16.msra.mxu1 %v1473_v21  ;;  %1260 = vmatprep.mubr.msk.f32.mxu1 %vm1412_vm1, %v1413_v22 }
 0x594   :  { %1302 = vmatprep.subr.bf16.mxu1 %v1411_v20 }
 0x665   :  { %v494_v14 = vpop.f32.mrb[2].mxu1 }
 0x666   :  { %v498_v15 = vadd.f32 %v494_v14, %v182_v13  ;;  %v1248_v16 = vpop.f32.mrb[3].mxu1 }
 0x668   :  { %1338 = vtanh.f32 %v498_v15  ;;  %v1184_v18 = vmul.f32 -1.442695, %v498_v15 }
 0x66a   :  { %1340 = vpow2.f32 %v1184_v18 }
 0x672   :  { %v1339_v17 = vpop.eup %1338 }
 0x673   :  { %508 = vrot.lane.b32.xlu0 %v1339_v17, %s1414_s4 }
 0x674   :  { %v1341_v19 = vpop.eup %1340 }
 0x675   :  { %v502_v24 = vadd.f32 1.0, %v1341_v19 }
 0x677   :  { %1342 = vrcp.f32 %v502_v24 }
 0x681   :  { %v1343_v25 = vpop.eup %1342 }
 0x682   :  { %v506_v28 = vmul.f32 %v1343_v25, %v409_v6 }
 0x6e5   :  { %v509_v26 = vpop.permute.xlu0 %508 }
 0x6e6   :  { %v511_v27 = vmul.f32 %v1343_v25, %v509_v26 }
 0x6e8   :  { %513 = vrot.lane.b32.xlu1 %v511_v27, %s1415_s5 }
 0x75a   :  { %v514_v29 = vpop.permute.xlu1 %513 }
 0x75b   :  { %v516_v30 = vadd.f32 %v514_v29, %v506_v28 }
 0x75d   :  { %1344 = vtanh.f32 %v516_v30 }
 0x767   :  { %v1345_v31 = vpop.eup %1344 }
 0x768   :  { %519 = vrot.lane.b32.xlu0 %v1345_v31, %s1416_s6  ;;  %v185_v31 = vcombine.high %v1499_v37, %v1499_v37 }
 0x7da   :  { %v520_v32 = vpop.permute.xlu0 %519 }
 0x7db   :  { %v522_v33 = vmul.f32 %v1343_v25, %v520_v32  ;;  %v199_v32 = vrot.slane %v185_v31, %v1478_v23 }
 0x7dd   :  { %v530_v34 = vrot.slane %v522_v33, %v1478_v23 }
 0x7df   :  { %531 = vrot.lane.b32.xlu1 %v530_v34, %s1417_s7 }
 0x851   :  { %v532_v35 = vpop.permute.xlu1 %531 }
 0x852   :  { %1254 = vmatmul.mubr.msk.f32.vlgmr.msra.gmra.mrb[4].mxu0 %vm210_vm3, %v532_v35 }
 0x853   :  { %1301 = vmatpush3.bf16.msra.mxu0 %v1473_v21  ;;  %1267 = vmatprep.mubr.msk.f32.mxu0 %vm1412_vm1, %v1413_v22 }
 0x854   :  { %1305 = vmatprep.subr.bf16.mxu0 %v1411_v20 }
 0x925   :  { %v601_v38 = vpop.f32.mrb[4].mxu0 }
 0x926   :  { %v605_v39 = vadd.f32 %v601_v38, %v184_v36  ;;  %v1255_v40 = vpop.f32.mrb[5].mxu0 }
 0x928   :  { %1346 = vtanh.f32 %v605_v39  ;;  %v1186_v42 = vmul.f32 -1.442695, %v605_v39 }
 0x92a   :  { %1348 = vpow2.f32 %v1186_v42 }
 0x932   :  { %v1347_v41 = vpop.eup %1346 }
 0x933   :  { %615 = vrot.lane.b32.xlu0 %v1347_v41, %s1414_s4 }
 0x934   :  { %v1349_v43 = vpop.eup %1348 }
 0x935   :  { %v609_v44 = vadd.f32 1.0, %v1349_v43 }
 0x937   :  { %1350 = vrcp.f32 %v609_v44 }
 0x941   :  { %v1351_v45 = vpop.eup %1350 }
 0x942   :  { %v613_v48 = vmul.f32 %v1351_v45, %v516_v30 }
 0x9a5   :  { %v616_v46 = vpop.permute.xlu0 %615 }
 0x9a6   :  { %v618_v47 = vmul.f32 %v1351_v45, %v616_v46 }
 0x9a8   :  { %620 = vrot.lane.b32.xlu1 %v618_v47, %s1415_s5 }
 0xa1a   :  { %v621_v20 = vpop.permute.xlu1 %620 }
 0xa1b   :  { %v623_v49 = vadd.f32 %v621_v20, %v613_v48 }
 0xa1d   :  { %1352 = vtanh.f32 %v623_v49 }
 0xa27   :  { %v1353_v50 = vpop.eup %1352 }
 0xa28   :  { %626 = vrot.lane.b32.xlu0 %v1353_v50, %s1416_s6  ;;  %v201_v50 = vcombine.high %v199_v32, %v199_v32 }
 0xa9a   :  { %v627_v51 = vpop.permute.xlu0 %626 }
 0xa9b   :  { %v629_v52 = vmul.f32 %v1351_v45, %v627_v51 }
 0xa9d   :  { %v637_v53 = vrot.slane %v629_v52, %v1478_v23 }
 0xa9f   :  { %638 = vrot.lane.b32.xlu1 %v637_v53, %s1417_s7 }
 0xb11   :  { %v639_v54 = vpop.permute.xlu1 %638 }
 0xb12   :  { %1261 = vmatmul.mubr.msk.f32.vlgmr.msra.gmra.mrb[4].mxu1 %vm210_vm3, %v639_v54  ;;  %v1582_v54 = vld [vmem:[%s1620_s1 + $0x13] ss:$0 sm:$0xff]  ;;  %s1419_s1 = smov 112  }
 0xb13   :  { %1304 = vmatpush3.bf16.msra.mxu1 %v1473_v21  ;;  %1274 = vmatprep.mubr.msk.f32.mxu1 %vm1412_vm1, %v1413_v22 }
 0xbe5   :  { %v708_v56 = vpop.f32.mrb[4].mxu1 }
 0xbe6   :  { %v712_v57 = vadd.f32 %v708_v56, %v192_v55  ;;  %v1262_v58 = vpop.f32.mrb[5].mxu1  ;;  %v748_v56 = vrot.slane %v1582_v54, %v1478_v23 }
 0xbe8   :  { %1354 = vtanh.f32 %v712_v57  ;;  %v1188_v60 = vmul.f32 -1.442695, %v712_v57 }
 0xbea   :  { %1356 = vpow2.f32 %v1188_v60 }
 0xbf2   :  { %v1355_v59 = vpop.eup %1354 }
 0xbf3   :  { %722 = vrot.lane.b32.xlu0 %v1355_v59, %s1414_s4 }
 0xbf4   :  { %v1357_v61 = vpop.eup %1356 }
 0xbf5   :  { %v716_v62 = vadd.f32 1.0, %v1357_v61 }
 0xbf7   :  { %1358 = vrcp.f32 %v716_v62 }
 0xc01   :  { %v1359_v63 = vpop.eup %1358 }
 0xc02   :  { %v720_v2 = vmul.f32 %v1359_v63, %v623_v49 }
 0xc65   :  { %v723_v0 = vpop.permute.xlu0 %722 }
 0xc66   :  { %v725_v1 = vmul.f32 %v1359_v63, %v723_v0 }
 0xc68   :  { %727 = vrot.lane.b32.xlu1 %v725_v1, %s1415_s5 }
 0xcda   :  { %v728_v3 = vpop.permute.xlu1 %727 }
 0xcdb   :  { %v730_v4 = vadd.f32 %v728_v3, %v720_v2 }
 0xcdd   :  { %1360 = vtanh.f32 %v730_v4 }
 0xce7   :  { %v1361_v5 = vpop.eup %1360 }
 0xce8   :  { %733 = vrot.lane.b32.xlu0 %v1361_v5, %s1416_s6 }
 0xd5a   :  { %v734_v6 = vpop.permute.xlu0 %733 }
 0xd5b   :  { %v1552_v7 = vmul.f32 %v1359_v63, %v734_v6 }
 0xd5d   :  { %v782_v8 = vrot.slane %v1552_v7, %v1478_v23 }
 0xd5f   :  { %783 = vrot.lane.b32.xlu1 %v782_v8, %s1417_s7 }
 0xdd1   :  { %v784_v9 = vpop.permute.xlu1 %783 }
 0xdd2   :  { %1268 = vmatmul.mubr.msk.f32.vlgmr.msra.gmra.mrb[6].mxu0 %vm210_vm3, %v784_v9 }
 0xdd3   :  { %1307 = vmatpush3.bf16.msra.mxu0 %v1473_v21  ;;  %1281 = vmatprep.mubr.msk.f32.mxu0 %vm1412_vm1, %v1413_v22 }
 0xea5   :  { %v853_v11 = vpop.f32.mrb[6].mxu0 }
 0xea6   :  { %v857_v12 = vadd.f32 %v853_v11, %v200_v10  ;;  %v1269_v13 = vpop.f32.mrb[7].mxu0 }
 0xea8   :  { %1362 = vtanh.f32 %v857_v12  ;;  %v1191_v15 = vmul.f32 -1.442695, %v857_v12 }
 0xeaa   :  { %1364 = vpow2.f32 %v1191_v15 }
 0xeb2   :  { %v1363_v14 = vpop.eup %1362 }
 0xeb3   :  { %867 = vrot.lane.b32.xlu0 %v1363_v14, %s1414_s4 }
 0xeb4   :  { %v1365_v16 = vpop.eup %1364 }
 0xeb5   :  { %v861_v17 = vadd.f32 1.0, %v1365_v16 }
 0xeb7   :  { %1366 = vrcp.f32 %v861_v17 }
 0xec1   :  { %v1367_v18 = vpop.eup %1366 }
 0xec2   :  { %v865_v21 = vmul.f32 %v1367_v18, %v730_v4 }
 0xf25   :  { %v868_v19 = vpop.permute.xlu0 %867 }
 0xf26   :  { %v870_v24 = vmul.f32 %v1367_v18, %v868_v19 }
 0xf28   :  { %872 = vrot.lane.b32.xlu1 %v870_v24, %s1415_s5 }
 0xf9a   :  { %v873_v22 = vpop.permute.xlu1 %872 }
 0xf9b   :  { %v875_v25 = vadd.f32 %v873_v22, %v865_v21 }
 0xf9d   :  { %1368 = vtanh.f32 %v875_v25 }
 0xfa7   :  { %v1369_v26 = vpop.eup %1368 }
 0xfa8   :  { %878 = vrot.lane.b32.xlu0 %v1369_v26, %s1416_s6 }
0x101a   :  { %v879_v27 = vpop.permute.xlu0 %878 }
0x101b   :  { %v1564_v28 = vmul.f32 %v1367_v18, %v879_v27 }
0x101d   :  { %v911_v29 = vrot.slane %v1564_v28, %v1478_v23 }
0x101f   :  { %912 = vrot.lane.b32.xlu1 %v911_v29, %s1417_s7 }
0x1091   :  { %v913_v30 = vpop.permute.xlu1 %912 }
0x1092   :  { %1275 = vmatmul.mubr.msk.f32.vlgmr.msra.gmra.mrb[6].mxu1 %vm210_vm3, %v913_v30 }
0x1165   :  { %v982_v33 = vpop.f32.mrb[6].mxu1 }
0x1166   :  { %v986_v34 = vadd.f32 %v982_v33, %v199_v32  ;;  %v1276_v35 = vpop.f32.mrb[7].mxu1 }
0x1168   :  { %1370 = vtanh.f32 %v986_v34  ;;  %v1193_v38 = vmul.f32 -1.442695, %v986_v34 }
0x116a   :  { %1372 = vpow2.f32 %v1193_v38 }
0x1172   :  { %v1371_v36 = vpop.eup %1370 }
0x1173   :  { %996 = vrot.lane.b32.xlu0 %v1371_v36, %s1414_s4 }
0x1174   :  { %v1373_v39 = vpop.eup %1372 }
0x1175   :  { %v990_v40 = vadd.f32 1.0, %v1373_v39 }
0x1177   :  { %1374 = vrcp.f32 %v990_v40 }
0x1181   :  { %v1375_v41 = vpop.eup %1374 }
0x1182   :  { %v994_v37 = vmul.f32 %v1375_v41, %v875_v25 }
0x11e5   :  { %v997_v42 = vpop.permute.xlu0 %996 }
0x11e6   :  { %v999_v43 = vmul.f32 %v1375_v41, %v997_v42 }
0x11e8   :  { %1001 = vrot.lane.b32.xlu1 %v999_v43, %s1415_s5 }
0x125a   :  { %v1002_v44 = vpop.permute.xlu1 %1001 }
0x125b   :  { %v1004_v45 = vadd.f32 %v1002_v44, %v994_v37 }
0x125d   :  { %1376 = vtanh.f32 %v1004_v45 }
0x1267   :  { %v1377_v46 = vpop.eup %1376 }
0x1268   :  { %1007 = vrot.lane.b32.xlu0 %v1377_v46, %s1416_s6 }
0x12da   :  { %v1008_v47 = vpop.permute.xlu0 %1007 }
0x12db   :  { %v1010_v48 = vmul.f32 %v1375_v41, %v1008_v47 }
0x12dd   :  { %v1040_v20 = vrot.slane %v1010_v48, %v1478_v23 }
0x12df   :  { %1041 = vrot.lane.b32.xlu1 %v1040_v20, %s1417_s7 }
0x1351   :  { %v1042_v49 = vpop.permute.xlu1 %1041 }
0x1352   :  { %1282 = vmatmul.mubr.msk.f32.vlgmr.msra.gmra.mrb[8].mxu0 %vm210_vm3, %v1042_v49 }
0x1425   :  { %v1111_v51 = vpop.f32.mrb[8].mxu0 }
0x1426   :  { %v1115_v52 = vadd.f32 %v1111_v51, %v201_v50  ;;  %v1283_v53 = vpop.f32.mrb[9].mxu0 }
0x1428   :  { %1378 = vtanh.f32 %v1115_v52  ;;  %v1195_v57 = vmul.f32 -1.442695, %v1115_v52 }
0x142a   :  { %1380 = vpow2.f32 %v1195_v57 }
0x1432   :  { %v1379_v55 = vpop.eup %1378 }
0x1433   :  { %1125 = vrot.lane.b32.xlu0 %v1379_v55, %s1414_s4 }
0x1434   :  { %v1381_v58 = vpop.eup %1380 }
0x1435   :  { %v1119_v59 = vadd.f32 1.0, %v1381_v58 }
0x1437   :  { %749 = vrot.lane.b32.xlu0 %v748_v56, %s1418_s10  ;;  %1382 = vrcp.f32 %v1119_v59 }
0x1441   :  { %v1383_v60 = vpop.eup %1382 }
0x1442   :  { %v1123_v4 = vmul.f32 %v1383_v60, %v1004_v45 }
0x14a5   :  { %v1126_v61 = vpop.permute.xlu0 %1125 }
0x14a6   :  { %v1128_v62 = vmul.f32 %v1383_v60, %v1126_v61 }
0x14a8   :  { %1130 = vrot.lane.b32.xlu1 %v1128_v62, %s1415_s5 }
0x14a9   :  { %v750_v63 = vpop.permute.xlu0 %749 }
0x14aa   :  { %v752_v0 = vmul.f32 %v750_v63, %v1552_v7  ;;  %v1011_v1 = vmul.f32 %v1010_v48, %v750_v63  ;;  %v882_v11 = vmul.f32 %v1564_v28, %v750_v63 }
0x14ac   :  { %v760_v2 = vrot.slane %v752_v0, %v1478_v23  ;;  %v1019_v3 = vrot.slane %v1011_v1, %v1478_v23  ;;  %v890_v13 = vrot.slane %v882_v11, %v1478_v23 }
0x14ae   :  { %761 = vrot.lane.b32.xlu0 %v760_v2, %s1417_s7 }
0x14b2   :  { %1020 = vrot.lane.b32.xlu0 %v1019_v3, %s1417_s7 }
0x151a   :  { %v1131_v5 = vpop.permute.xlu1 %1130 }
0x151b   :  { %v1133_v6 = vadd.f32 %v1131_v5, %v1123_v4 }
0x151d   :  { %1384 = vtanh.f32 %v1133_v6 }
0x1520   :  { %v762_v8 = vpop.permute.xlu0 %761 }
0x1521   :  { %v765_v9 = vsel %vm764_vm4, %v762_v8, 0.0 }
0x1522   :  { %766 = vadd.xlane.f32.xlu0 %v765_v9 }
0x1524   :  { %v1021_v10 = vpop.permute.xlu0 %1020 }
0x1525   :  { %v1023_v7 = vsel %vm764_vm4, %v1021_v10, 0.0 }
0x1526   :  { %1024 = vadd.xlane.f32.xlu0 %v1023_v7 }
0x1527   :  { %v1385_v12 = vpop.eup %1384 }
0x1528   :  { %1136 = vrot.lane.b32.xlu1 %v1385_v12, %s1416_s6 }
0x152c   :  { %891 = vrot.lane.b32.xlu1 %v890_v13, %s1417_s7 }
0x159a   :  { %v1137_v14 = vpop.permute.xlu1 %1136 }
0x159b   :  { %v1139_v15 = vmul.f32 %v1383_v60, %v1137_v14 }
0x159d   :  { %v1140_v16 = vmul.f32 %v1139_v15, %v750_v63 }
0x159e   :  { %v892_v18 = vpop.permute.xlu1 %891 }
0x159f   :  { %v1148_v17 = vrot.slane %v1140_v16, %v1478_v23  ;;  %v894_v19 = vsel %vm764_vm4, %v892_v18, 0.0 }
0x15a1   :  { %1149 = vrot.lane.b32.xlu1 %v1148_v17, %s1417_s7 }
0x15af   :  { %v767_v24 = vpop.xlane.xlu0 %766 }
0x15b0   :  { %v768_v21 = vadd.f32 %v1582_v54, %v767_v24 }
0x15b3   :  { %v1025_v22 = vpop.xlane.xlu0 %1024 }
0x15b4   :  { %v1026_v25 = vadd.f32 %v1582_v54, %v1025_v22 }
0x15c5   :  { %895 = vadd.xlane.f32.xlu1 %v894_v19 }
0x15d6   :  { %770 = vrot.lane.b32.xlu1 %v768_v21, %s1419_s1 }
0x15da   :  { %1028 = vrot.lane.b32.xlu1 %v1026_v25, %s1420_s11 }
0x1613   :  { %v1150_v26 = vpop.permute.xlu1 %1149 }
0x1614   :  { %v1152_v27 = vsel %vm764_vm4, %v1150_v26, 0.0 }
0x1615   :  { %1153 = vadd.xlane.f32.xlu0 %v1152_v27 }
0x1652   :  { %v896_v23 = vpop.xlane.xlu1 %895 }
0x1653   :  { %v897_v28 = vadd.f32 %v1582_v54, %v896_v23 }
0x1655   :  { %899 = vrot.lane.b32.xlu0 %v897_v28, %s1421_s12 }
0x1656   :  { %v771_v29 = vpop.permute.xlu1 %770 }
0x1657   :  { %774 = vst.msk [vmem:[#allocation2] sm:$0x3] %vm773_vm5, %v771_v29 }
0x165a   :  { %v1029_v33 = vpop.permute.xlu1 %1028 }
0x16a2   :  { %v1154_v30 = vpop.xlane.xlu0 %1153 }
0x16a3   :  { %v1155_v31 = vadd.f32 %v1582_v54, %v1154_v30 }
0x16a5   :  { %1157 = vrot.lane.b32.xlu1 %v1155_v31, %s1422_s13 }
0x16c7   :  { %v900_v32 = vpop.permute.xlu0 %899 }
0x16c8   :  { %903 = vst.msk [vmem:[#allocation2] sm:$0x3] %vm902_vm6, %v900_v32 }
0x16c9   :  { %1032 = vst.msk [vmem:[#allocation2] sm:$0x3] %vm1031_vm7, %v1029_v33 }
0x1717   :  { %v1158_v34 = vpop.permute.xlu1 %1157 }
0x1718   :  { %1161 = vst.msk [vmem:[#allocation2] sm:$0x3] %vm1160_vm8, %v1158_v34 }
0x1719   :  { %1397 = shalt.err (!%p1394_p4)
}
0x171a   :  { %s1398_s19 = scalar_lea.hbm %s1621_s2, 32 }
0x171b   :  { %p1399_p5 = scmp.ne.s32.totalorder %s1621_s2, %s1398_s19  ;;  %p1402_p6 = scmp.lt.u32.totalorder %s1398_s19, %s1621_s2 }
0x171d   :  { %p1404_p7 = pnand %p1402_p6, %p1399_p5 }
0x171f   :  { %1407 = shalt.err (!%p1404_p7)
}
0x1720   :  { %1171 = dma.vmem_to_hbm [thread:$0]  %s1169_s15, 32, %s1621_s2, [#allocation3]  }
0x1721   :  { %1408 = dma.done.wait [#allocation3], 32  }
0x1722   :  { %1409 = vsyncadd [#allocation3], 4294967264 }
0x1723   :  { %1175 = vsyncpa [#allocation3], 1 }

</bundles_post_ra>
